<compile_context>
chip_gen: v6e
topology: v6e:2x2x1
jax: 0.10.0
libtpu: 0.0.40
codegen_flags: <defaults>
</compile_context>

<pallas_src>
import jax
import jax.numpy as jnp
from jax import lax
from jax.experimental import pallas as pl
from jax.experimental.pallas import tpu as pltpu

EPS = 1e-6


def _cdiv(a, b):
    return -(-a // b)


def _round_up(a, m):
    return _cdiv(a, m) * m


def _norm2d_kernel(x_ref, g_ref, b_ref, o_ref):
    # x_ref: (nb, C, tile_hw) block of the (B, C, HW) tensor.
    # LayerNorm reduces over the channel axis (axis=1, sublanes); lanes (spatial
    # positions) and batch rows are fully independent, so overhang lanes/rows in
    # a partial last block only produce garbage in their own (masked) outputs.
    x = x_ref[...].astype(jnp.float32)
    inv_c = 1.0 / x.shape[1]
    mean = jnp.sum(x, axis=1, keepdims=True) * inv_c           # (nb, 1, tile_hw)
    xc = x - mean
    var = jnp.sum(xc * xc, axis=1, keepdims=True) * inv_c      # biased, like nn.LayerNorm
    inv = lax.rsqrt(var + EPS)
    gamma = g_ref[...].astype(jnp.float32)                     # (1, C, 1) -> broadcast
    beta = b_ref[...].astype(jnp.float32)                      # (1, C, 1)
    o_ref[...] = (xc * inv * gamma + beta).astype(o_ref.dtype)


def _vmem_capacity_bytes():
    try:
        cap = int(pltpu.get_tpu_info().vmem_capacity_bytes)
        if cap > 0:
            return cap
    except Exception:
        pass
    return 64 << 20  # conservative default = v7x per-TC VMEM


def _pick_tiling(b, c, hw, itemsize, tile_budget_bytes):
    """Choose (nb, tile_hw): batch rows and spatial lanes per block."""
    # Conservative per-lane VMEM cost: (double/triple-buffered in + out tiles)
    # plus ~3 f32 working copies inside the kernel body.
    per_lane = c * (6 * itemsize + 12)
    cap_lanes = tile_budget_bytes // max(per_lane, 1)
    cap_lanes = max(128, min(16384, (cap_lanes // 128) * 128))

    if hw <= cap_lanes:
        # Whole spatial extent in one block (block dim == full dim is always
        # legal even if hw is not a multiple of 128).  Pack several batch rows
        # per block to amortize the fixed per-grid-step overhead.
        tile_hw = hw
        nb = max(1, min(b, cap_lanes // max(_round_up(hw, 128), 128)))
    else:
        # Large spatial extent: biggest 128-multiple lane tile in budget; the
        # partial last HW block is masked by Pallas (no pad / slice needed).
        tile_hw = cap_lanes
        nb = 1

    # Keep >= 2 grid steps where possible so v7x shards across its two TCs.
    def steps(t, n):
        return _cdiv(b, n) * _cdiv(hw, t)

    while steps(tile_hw, nb) < 2 and nb > 1:
        nb = max(1, nb // 2)
    if steps(tile_hw, nb) < 2 and hw > 128:
        tile_hw = max(128, _round_up(_cdiv(hw, 2), 128))

    return nb, tile_hw


def _layernorm_nchw(x3d, gamma, beta, *, nb, tile_hw, vmem_bytes):
    """LayerNorm over axis 1 (channels) of a (B, C, HW) array via Pallas."""
    b, c, hw = x3d.shape
    grid = (_cdiv(b, nb), _cdiv(hw, tile_hw))
    x_spec = pl.BlockSpec((nb, c, tile_hw), lambda i, j: (i, 0, j))
    p_spec = pl.BlockSpec((1, c, 1), lambda i, j: (0, 0, 0))
    return pl.pallas_call(
        _norm2d_kernel,
        out_shape=jax.ShapeDtypeStruct((b, c, hw), x3d.dtype),
        grid_spec=pltpu.PrefetchScalarGridSpec(
            num_scalar_prefetch=0,
            grid=grid,
            in_specs=[x_spec, p_spec, p_spec],
            out_specs=pl.BlockSpec((nb, c, tile_hw), lambda i, j: (i, 0, j)),
        ),
        compiler_params=pltpu.CompilerParams(
            dimension_semantics=("parallel", "parallel"),
            vmem_limit_bytes=vmem_bytes,
        ),
    )(x3d, gamma, beta)


def norm2d(x_nchw, gamma, beta):
    """Equivalent of Norm2d.forward: NCHW in, NCHW out, LayerNorm over C."""
    b, c, h, w = x_nchw.shape
    hw = h * w
    itemsize = jnp.dtype(x_nchw.dtype).itemsize

    # (B, C, H, W) -> (B, C, HW): metadata-only reshape; no transpose, no pad.
    x3d = x_nchw.reshape(b, c, hw)

    # Generation-aware budgets: v5e/v6e have 128 MiB VMEM, v7x only 64 MiB/TC.
    vmem_cap = _vmem_capacity_bytes()
    if vmem_cap >= (96 << 20):
        tile_budget, vmem_clamp = 40 << 20, 80 << 20
    else:
        tile_budget, vmem_clamp = 20 << 20, 40 << 20

    nb, tile_hw = _pick_tiling(b, c, hw, itemsize, tile_budget)

    per_lane = c * (6 * itemsize + 12)
    need = nb * _round_up(tile_hw, 128) * per_lane + (2 << 20)
    vmem_bytes = int(min(max(need, 16 << 20), vmem_clamp))

    g3 = gamma.reshape(1, c, 1)
    b3 = beta.reshape(1, c, 1)
    y3d = _layernorm_nchw(x3d, g3, b3, nb=nb, tile_hw=tile_hw,
                          vmem_bytes=vmem_bytes)
    return y3d.reshape(b, c, h, w)


def _reference_norm2d(x_nchw, gamma, beta):
    x = jnp.transpose(x_nchw, (0, 2, 3, 1)).astype(jnp.float32)
    mean = jnp.mean(x, axis=-1, keepdims=True)
    var = jnp.mean((x - mean) ** 2, axis=-1, keepdims=True)
    y = (x - mean) / jnp.sqrt(var + EPS) * gamma + beta
    return jnp.transpose(y, (0, 3, 1, 2)).astype(x_nchw.dtype)


if __name__ == "__main__":
    key = jax.random.PRNGKey(0)

    # Shapes consistent with Norm2d(embed_dim=32) on a small NCHW feature map.
    batch, embed_dim, height, width = 2, 32, 16, 16
    x = jax.random.normal(key, (batch, embed_dim, height, width), dtype=jnp.float32)
    gamma = 1.0 + 0.01 * jnp.arange(embed_dim, dtype=jnp.float32)
    beta = 0.001 * jnp.arange(embed_dim, dtype=jnp.float32)

    y = jax.block_until_ready(norm2d(x, gamma, beta))
    y_ref = _reference_norm2d(x, gamma, beta)
    assert y.shape == x.shape and y.dtype == x.dtype
    assert jnp.max(jnp.abs(y - y_ref)) < 1e-4

    # H*W = 196 (not a multiple of 128): full-extent lane block, no pad/slice.
    x2 = jax.random.normal(jax.random.PRNGKey(1),
                           (3, embed_dim, 14, 14), dtype=jnp.float32)
    y2 = jax.block_until_ready(norm2d(x2, gamma, beta))
    y2_ref = _reference_norm2d(x2, gamma, beta)
    assert y2.shape == x2.shape
    assert jnp.max(jnp.abs(y2 - y2_ref)) < 1e-4

    # Explicitly exercise the masked partial-block path (both a partial batch
    # block and a partial 128-lane HW block) with a forced small tiling.
    x3 = x2.reshape(3, embed_dim, 196)
    y3 = jax.block_until_ready(
        _layernorm_nchw(x3, gamma.reshape(1, embed_dim, 1),
                        beta.reshape(1, embed_dim, 1),
                        nb=2, tile_hw=128, vmem_bytes=16 << 20))
    y3 = y3.reshape(3, embed_dim, 14, 14)
    assert jnp.max(jnp.abs(y3 - y2_ref)) < 1e-4

    print("KERNEL_OK")
</pallas_src>

<mosaic_0001>
module attributes {stable_mosaic.version = 11 : i64} {
  func.func @_norm2d_kernel(%arg0: i32, %arg1: i32, %arg2: memref<1x32x256xf32, #tpu.memory_space<vmem>>, %arg3: memref<1x32x1xf32, #tpu.memory_space<vmem>>, %arg4: memref<1x32x1xf32, #tpu.memory_space<vmem>>, %arg5: memref<1x32x256xf32, #tpu.memory_space<vmem>>) attributes {dimension_semantics = [#tpu.dimension_semantics<parallel>, #tpu.dimension_semantics<parallel>], iteration_bounds = array<i64: 2, 1>, scalar_prefetch = 0 : i64, scratch_operands = 0 : i64, tpu.core_type = #tpu.core_type<tc>, window_params = [{transform_indices = @transform_0, window_bounds = array<i64: 1, 32, 256>}, {pipeline_mode = #tpu.pipeline_mode<synchronous>, transform_indices = @transform_1, window_bounds = array<i64: 1, 32, 1>}, {pipeline_mode = #tpu.pipeline_mode<synchronous>, transform_indices = @transform_2, window_bounds = array<i64: 1, 32, 1>}, {transform_indices = @transform_3, window_bounds = array<i64: 1, 32, 256>}]} {
    %c0 = arith.constant 0 : index
    %c0_0 = arith.constant 0 : index
    %c0_1 = arith.constant 0 : index
    %0 = vector.load %arg2[%c0, %c0_0, %c0_1] : memref<1x32x256xf32, #tpu.memory_space<vmem>>, vector<1x32x256xf32>
    %cst = arith.constant dense<0.000000e+00> : vector<1x256xf32>
    %1 = vector.multi_reduction <add>, %0, %cst [1] : vector<1x32x256xf32> to vector<1x256xf32>
    %2 = vector.shape_cast %1 : vector<1x256xf32> to vector<1x1x256xf32>
    %cst_2 = arith.constant 3.125000e-02 : f32
    %3 = vector.broadcast %cst_2 : f32 to vector<1x1x256xf32>
    %4 = arith.mulf %2, %3 : vector<1x1x256xf32>
    %5 = vector.broadcast %4 : vector<1x1x256xf32> to vector<1x32x256xf32>
    %6 = arith.subf %0, %5 : vector<1x32x256xf32>
    %7 = arith.mulf %6, %6 : vector<1x32x256xf32>
    %cst_3 = arith.constant dense<0.000000e+00> : vector<1x256xf32>
    %8 = vector.multi_reduction <add>, %7, %cst_3 [1] : vector<1x32x256xf32> to vector<1x256xf32>
    %9 = vector.shape_cast %8 : vector<1x256xf32> to vector<1x1x256xf32>
    %cst_4 = arith.constant 3.125000e-02 : f32
    %10 = vector.broadcast %cst_4 : f32 to vector<1x1x256xf32>
    %11 = arith.mulf %9, %10 : vector<1x1x256xf32>
    %cst_5 = arith.constant 9.99999997E-7 : f32
    %12 = vector.broadcast %cst_5 : f32 to vector<1x1x256xf32>
    %13 = arith.addf %11, %12 : vector<1x1x256xf32>
    %14 = math.rsqrt %13 : vector<1x1x256xf32>
    %c0_6 = arith.constant 0 : index
    %c0_7 = arith.constant 0 : index
    %c0_8 = arith.constant 0 : index
    %15 = vector.load %arg3[%c0_6, %c0_7, %c0_8] : memref<1x32x1xf32, #tpu.memory_space<vmem>>, vector<1x32x1xf32>
    %c0_9 = arith.constant 0 : index
    %c0_10 = arith.constant 0 : index
    %c0_11 = arith.constant 0 : index
    %16 = vector.load %arg4[%c0_9, %c0_10, %c0_11] : memref<1x32x1xf32, #tpu.memory_space<vmem>>, vector<1x32x1xf32>
    %17 = vector.broadcast %14 : vector<1x1x256xf32> to vector<1x32x256xf32>
    %18 = arith.mulf %6, %17 : vector<1x32x256xf32>
    %19 = vector.broadcast %15 : vector<1x32x1xf32> to vector<1x32x256xf32>
    %20 = arith.mulf %18, %19 : vector<1x32x256xf32>
    %21 = vector.broadcast %16 : vector<1x32x1xf32> to vector<1x32x256xf32>
    %22 = arith.addf %20, %21 : vector<1x32x256xf32>
    %c0_12 = arith.constant 0 : index
    %c0_13 = arith.constant 0 : index
    %c0_14 = arith.constant 0 : index
    %23 = vector.load %arg5[%c0_12, %c0_13, %c0_14] : memref<1x32x256xf32, #tpu.memory_space<vmem>>, vector<1x32x256xf32>
    tpu.vector_store %arg5[%c0_12, %c0_13, %c0_14], %22 {strides = array<i32>} : memref<1x32x256xf32, #tpu.memory_space<vmem>>, vector<1x32x256xf32>,
    return
  }
  func.func @transform_0(%arg0: i32, %arg1: i32) -> (i32, i32, i32) {
    %c0_i32 = arith.constant 0 : i32
    %c0_i32_0 = arith.constant 0 : i32
    return %arg0, %c0_i32, %arg1 : i32, i32, i32
  }
  func.func @transform_1(%arg0: i32, %arg1: i32) -> (i32, i32, i32) {
    %c0_i32 = arith.constant 0 : i32
    %c0_i32_0 = arith.constant 0 : i32
    %c0_i32_1 = arith.constant 0 : i32
    %c0_i32_2 = arith.constant 0 : i32
    return %c0_i32, %c0_i32_0, %c0_i32_1 : i32, i32, i32
  }
  func.func @transform_2(%arg0: i32, %arg1: i32) -> (i32, i32, i32) {
    %c0_i32 = arith.constant 0 : i32
    %c0_i32_0 = arith.constant 0 : i32
    %c0_i32_1 = arith.constant 0 : i32
    %c0_i32_2 = arith.constant 0 : i32
    return %c0_i32, %c0_i32_0, %c0_i32_1 : i32, i32, i32
  }
  func.func @transform_3(%arg0: i32, %arg1: i32) -> (i32, i32, i32) {
    %c0_i32 = arith.constant 0 : i32
    %c0_i32_0 = arith.constant 0 : i32
    return %arg0, %c0_i32, %arg1 : i32, i32, i32
  }
}

</mosaic_0001>

<bundles_post_ra>
// kernel: tpu_custom_call.1
= control target key start
LH: loop header
LB: loop body
LE: loop exit
PB: predicated region body
PF: predicated region fallthrough
CT: control target
= control target key end

     0   :  { %8 = vsyncpa [#allocation3], 0  ;;  %s871_s0 = inlined_call_operand.hbm [shape: f32[2,32,256], index: 0, kind: input, shape index: {}]   ;;  %s872_s1 = inlined_call_operand.vmem [shape: f32[1,32,1], index: 1, kind: input, shape index: {}]   ;;  %s873_s2 = inlined_call_operand.vmem [shape: f32[1,32,1], index: 2, kind: input, shape index: {}]   ;;  %s874_s3 = inlined_call_operand.hbm [shape: f32[2,32,256], index: 3, kind: output, shape index: {}]  }
   0x1   :  { %10 = vsyncpa [#allocation3 + $0x1], 0 }
   0x2   :  { %11 = vsyncpa [#allocation4], 0 }
   0x3   :  { %13 = vsyncpa [#allocation4 + $0x1], 0  ;;  %s687_s12 = smov 0   ;;  %s689_s13 = smov 0  }
   0x4   :  { %s691_s14 = smov 0   ;;  %s693_s15 = smov 0  }
   0x5   :  { %s695_s16 = smov 0   ;;  %s697_s17 = smov 0  }
   0x6 LB: > { %s460_s18 = sadd.s32 4294967295, %s658_s17   ;;  %s461_s19 = sadd.s32 4294967294, %s658_s17   ;;  %s658_s17 = sphi %s697_s17, %s19_s17   ;;  %s654_s16 = sphi %s695_s16, %s885_s16   ;;  %s650_s15 = sphi %s693_s15, %s884_s15   ;;  %s646_s14 = sphi %s691_s14, %s883_s14   ;;  %s642_s13 = sphi %s689_s13, %s882_s13   ;;  %s638_s12 = sphi %s687_s12, %s881_s12  }
   0x7   : > { %s31_s20 = sadd.s32 1, %s654_s16  ;;  %s40_s21 = sadd.s32 1, %s646_s14 }
   0x8   : > { %p33_p0 = scmp.ge.s32.totalorder %s31_s20, 2  ;;  %p47_p1 = scmp.ne.s32.totalorder %s646_s14, %s642_s13 }
   0x9   : > { %p48_p2 = scmp.eq.s32.totalorder %s658_s17, 0  ;;  %p53_p3 = scmp.ne.s32.totalorder %s642_s13, %s638_s12 }
   0xa   : > { %s887_s20 = smov (%p33_p0, %s31_s20), 0  ;;  %p54_p5 = scmp.eq.s32.totalorder %s460_s18, 0 }
   0xb   : > { %p728_p4 = por %p48_p2, %p47_p1  ;;  %s35_s23 = ssub.s32 %s654_s16, %s887_s20 }
   0xc   : > { %p121_p6 = scmp.eq.s32.totalorder %s460_s18, 1  ;;  %p38_p7 = scmp.eq.s32.totalorder %s35_s23, 0 }
   0xd   : > { %p734_p8 = por %p54_p5, %p53_p3  ;;  %p127_p10 = scmp.eq.s32.totalorder %s461_s19, 1 }
   0xe   : > { %p738_p9 = por %p121_p6, %p47_p1  ;;  %p489_p13 = scmp.lt.s32.totalorder %s658_s17, 2 }
   0xf   : > { %s743_s26 = scalar_select %p38_p7, %s646_s14, %s40_s21  }
  0x10   : > { %p745_p11 = por %p127_p10, %p53_p3  ;;  %s153_s28 = sand.u32 1, %s646_s14  }
  0x11   : > { %s464_s29 = sshll.u32 %s153_s28, 6  ;;  %s475_s30 = sshll.u32 %s654_s16, 10 }
  0x12   : > { %s165_s6 = scalar_lea.hbm %s871_s0, %s475_s30  ;;  %s157_s7 = scalar_lea.vmem [#allocation2], %s464_s29 }
  0x13   : > { %s166_s8 = sshll.u32 %s157_s7, 4  ;;  %p758_p0 = pnand %p489_p13, %p728_p4  ;;  %s167_s8 = int_to_ptr.vmem [resolvable:$true] %s166_s8 }
  0x14   : > { %p467_p1 = scmp.ge.s32.totalorder %s658_s17, 1  ;;  %s154_s10 = scalar_lea.sflag [#allocation3], %s153_s28 }
  0x15   : > { %p552_p2 = pneg %p758_p0  ;;  %s563_s11 = scalar_lea.vmem %s167_s8, 1024 }
  0x16   : > { %p564_p3 = scmp.ne.s32.totalorder %s167_s8, %s563_s11  ;;  %s660_s18 = smov [#allocation2]  }
  0x17   : > { %s568_s19 = sshll.u32 %s660_s18, 4  ;;  %s569_s19 = int_to_ptr.vmem [resolvable:$false] %s568_s19 }
  0x18   : > { %p566_p5 = pnand %p564_p3, %p552_p2  ;;  %s570_s21 = scalar_lea.vmem %s569_s19, 2048 }
  0x19   : > { %p571_p7 = scmp.lt.s32.totalorder %s167_s8, %s569_s19  ;;  %p572_p10 = scmp.lt.s32.totalorder %s570_s21, %s563_s11 }
  0x1a   : > { %p567_p6 = pneg %p566_p5 }
  0x1b   : > { %p573_p12 = por %p572_p10, %p571_p7 }
  0x1d   : > { %p574_p4 = pnand %p573_p12, %p567_p6 }
  0x1f   : > { %577 = shalt.err (!%p574_p4)
}
  0x20   : > { %s661_s22 = smov 256   ;;  %s662_s23 = smov 16  }
  0x21   : > { %484 = dma.hbm_to_vmem [thread:$0]  (!%p758_p0), %s165_s6, 1024, %s167_s8, %s154_s10, %s661_s22, %s661_s22, %s662_s23  }
  0x22   : > { %p174_p13 = scmp.lt.s32.totalorder %s658_s17, 3 }
  0x24   : > { %p175_p2 = pnand %p467_p1, %p174_p13 }
  0x25   : > { %s771_s28 = sand.u32 (!%p175_p2), 1, %s642_s13  }
  0x26   : > { %178 = sbr.rel (%p175_p2) target bundleno = 199 (0xc7), region = 32  ;;  %s468_s29 = sshll.u32 (!%p175_p2), %s771_s28, 6 }
  0x27   : > { %s181_s30 = scalar_lea.sflag (!%p175_p2), [#allocation3], %s771_s28  ;;  %s777_s4 = scalar_lea.vmem (!%p175_p2), [#allocation2], %s468_s29 }
  0x2b   : > { %629 = dma.done.wait (%p734_p8), %s181_s30, 1024  }
  0x2c   : > { %631 = vsyncadd (%p734_p8), %s181_s30, 4294966272  ;;  %v663_v0 = vmov 0   ;;  %v279_v1 = vld [vmem:[%s872_s1 + $0x10] sm:$0xff]  ;;  %v277_v2 = vld [vmem:[%s872_s1] sm:$0xff]  ;;  %s476_s8 = sshll.u32 %s650_s15, 10  ;;  %s358_s10 = scalar_lea.sflag [#allocation4], %s771_s28 }
  0x2d   : > { %545 = vset.pattern.permute.xlu1 %v663_v0  ;;  %544 = vset.pattern.permute.xlu0 %v663_v0  ;;  %v280_v3 = vld [vmem:[%s872_s1 + $0x18] sm:$0xff]  ;;  %v278_v4 = vld [vmem:[%s872_s1 + $0x8] sm:$0xff]  ;;  %v281_v6 = vld [vmem:[%s873_s2] sm:$0xff]  ;;  %s823_s15 = scalar_lea.hbm %s874_s3, %s476_s8  ;;  %s664_s11 = smov [#allocation5]  }
  0x2e   : > { %305 = vperm.xlu1 %545, %v279_v1   ;;  %295 = vperm.xlu0 %544, %v277_v2   ;;  %v282_v5 = vld [vmem:[%s873_s2 + $0x8] sm:$0xff]  ;;  %v284_v7 = vld [vmem:[%s873_s2 + $0x18] sm:$0xff]  ;;  %v283_v8 = vld [vmem:[%s873_s2 + $0x10] sm:$0xff]  ;;  %s582_s18 = sshll.u32 %s664_s11, 4  ;;  %s583_s18 = int_to_ptr.vmem [resolvable:$false] %s582_s18 }
  0x2f   : > { %v209_v9 = vld [vmem:[%s777_s4] sm:$0xff]  ;;  %v211_v10 = vld [vmem:[%s777_s4 + $0x10] sm:$0xff]  ;;  %v210_v11 = vld [vmem:[%s777_s4 + $0x8] sm:$0xff]  ;;  %s584_s19 = scalar_lea.vmem %s583_s18, 2048 }
  0x30   : > { %v212_v12 = vld [vmem:[%s777_s4 + $0x18] sm:$0xff]  ;;  %v217_v13 = vadd.f32 %v211_v10, %v209_v9  ;;  %v213_v14 = vld [vmem:[%s777_s4 + $0x20] sm:$0xff]  ;;  %v214_v16 = vld [vmem:[%s777_s4 + $0x28] sm:$0xff] }
  0x31   : > { %v226_v15 = vadd.f32 %v212_v12, %v210_v11  ;;  %v215_v18 = vld [vmem:[%s777_s4 + $0x30] sm:$0xff]  ;;  %v216_v20 = vld [vmem:[%s777_s4 + $0x38] sm:$0xff]  ;;  %s206_s4 = scalar_lea.vmem [#allocation5], %s468_s29 }
  0x32   : > { %310 = vperm.xlu1 %545, %v280_v3   ;;  %300 = vperm.xlu0 %544, %v278_v4   ;;  %v218_v17 = vadd.f32 %v217_v13, %v213_v14  ;;  %s373_s7 = sshll.u32 %s206_s4, 4  ;;  %s818_s7 = int_to_ptr.vmem [resolvable:$true] %s373_s7 }
  0x33   : > { %v227_v19 = vadd.f32 %v226_v15, %v214_v16  ;;  %s578_s24 = scalar_lea.vmem %s818_s7, 1024  ;;  %p585_p1 = scmp.lt.s32.totalorder %s818_s7, %s583_s18 }
  0x34   : > { %v219_v21 = vadd.f32 %v218_v17, %v215_v18  ;;  %p579_p8 = scmp.ne.s32.totalorder %s818_s7, %s578_s24  ;;  %p586_p3 = scmp.lt.s32.totalorder %s584_s19, %s578_s24 }
  0x35   : > { %v228_v22 = vadd.f32 %v227_v19, %v216_v20 }
  0x36   : > { %328 = vperm.xlu1 %545, %v282_v5   ;;  %323 = vperm.xlu0 %544, %v281_v6   ;;  %v220_v23 = vrot.slane %v219_v21, 4  ;;  %p580_p12 = pnand %p579_p8, %p738_p9  ;;  %p587_p5 = por %p586_p3, %p585_p1 }
  0x37   : > { %v229_v24 = vrot.slane %v228_v22, 4 }
  0x38   : > { %v221_v25 = vadd.f32 %v220_v23, %v219_v21  ;;  %p581_p0 = pneg %p580_p12 }
  0x39   : > { %v230_v26 = vadd.f32 %v229_v24, %v228_v22 }
  0x3a   : > { %338 = vperm.xlu1 %545, %v284_v7   ;;  %333 = vperm.xlu0 %544, %v283_v8   ;;  %v222_v27 = vrot.slane %v221_v25, 2  ;;  %p588_p6 = pnand %p587_p5, %p581_p0 }
  0x3b   : > { %v231_v28 = vrot.slane %v230_v26, 2 }
  0x3c   : > { %v223_v29 = vadd.f32 %v222_v27, %v221_v25 }
  0x3d   : > { %v232_v30 = vadd.f32 %v231_v28, %v230_v26 }
  0x3e   : > { %v224_v31 = vrot.slane %v223_v29, 1 }
  0x3f   : > { %v233_v32 = vrot.slane %v232_v30, 1 }
  0x40   : > { %v225_v33 = vadd.f32 %v224_v31, %v223_v29 }
  0x41   : > { %v234_v34 = vadd.f32 %v233_v32, %v232_v30 }
  0x42   : > { %v235_v35 = vmul.f32 0.03125, %v225_v33 }
  0x43   : > { %v236_v36 = vmul.f32 0.03125, %v234_v34 }
  0x44   : > { %v237_v37 = vsub.f32 %v209_v9, %v235_v35  ;;  %v239_v38 = vsub.f32 %v211_v10, %v235_v35  ;;  %v241_v41 = vsub.f32 %v213_v14, %v235_v35  ;;  %v243_v47 = vsub.f32 %v215_v18, %v235_v35 }
  0x45   : > { %v238_v39 = vsub.f32 %v210_v11, %v236_v36  ;;  %v240_v40 = vsub.f32 %v212_v12, %v236_v36  ;;  %v242_v44 = vsub.f32 %v214_v16, %v236_v36  ;;  %v244_v50 = vsub.f32 %v216_v20, %v236_v36 }
  0x46   : > { %v245_v42 = vmul.f32 %v237_v37, %v237_v37  ;;  %v247_v43 = vmul.f32 %v239_v38, %v239_v38  ;;  %v249_v48 = vmul.f32 %v241_v41, %v241_v41  ;;  %v251_v53 = vmul.f32 %v243_v47, %v243_v47 }
  0x47   : > { %v246_v45 = vmul.f32 %v238_v39, %v238_v39  ;;  %v248_v46 = vmul.f32 %v240_v40, %v240_v40  ;;  %v250_v51 = vmul.f32 %v242_v44, %v242_v44  ;;  %v252_v55 = vmul.f32 %v244_v50, %v244_v50 }
  0x48   : > { %v253_v49 = vadd.f32 %v247_v43, %v245_v42 }
  0x49   : > { %v262_v52 = vadd.f32 %v248_v46, %v246_v45 }
  0x4a   : > { %v254_v54 = vadd.f32 %v253_v49, %v249_v48 }
  0x4b   : > { %v263_v56 = vadd.f32 %v262_v52, %v250_v51 }
  0x4c   : > { %v255_v57 = vadd.f32 %v254_v54, %v251_v53 }
  0x4d   : > { %v264_v58 = vadd.f32 %v263_v56, %v252_v55 }
  0x4e   : > { %v256_v59 = vrot.slane %v255_v57, 4 }
  0x4f   : > { %v265_v60 = vrot.slane %v264_v58, 4 }
  0x50   : > { %v257_v61 = vadd.f32 %v256_v59, %v255_v57 }
  0x51   : > { %v266_v62 = vadd.f32 %v265_v60, %v264_v58 }
  0x52   : > { %v258_v63 = vrot.slane %v257_v61, 2 }
  0x53   : > { %v267_v0 = vrot.slane %v266_v62, 2 }
  0x54   : > { %v259_v1 = vadd.f32 %v258_v63, %v257_v61 }
  0x55   : > { %v268_v2 = vadd.f32 %v267_v0, %v266_v62 }
  0x56   : > { %v260_v3 = vrot.slane %v259_v1, 1 }
  0x57   : > { %v269_v4 = vrot.slane %v268_v2, 1 }
  0x58   : > { %v261_v5 = vadd.f32 %v260_v3, %v259_v1 }
  0x59   : > { %v270_v6 = vadd.f32 %v269_v4, %v268_v2 }
  0x5a   : > { %v271_v7 = vmul.f32 0.03125, %v261_v5 }
  0x5b   : > { %v272_v8 = vmul.f32 0.03125, %v270_v6 }
  0x5c   : > { %v273_v9 = vadd.f32 1e-06, %v271_v7 }
  0x5d   : > { %v274_v10 = vadd.f32 1e-06, %v272_v8 }
  0x5e   : > { %546 = vrsqrt.f32 %v273_v9 }
  0x5f   : > { %548 = vrsqrt.f32 %v274_v10 }
  0x6b   : > { %v547_v11 = vpop.eup %546 }
  0x6c   : > { %v549_v12 = vpop.eup %548  ;;  %v285_v15 = vmul.f32 %v547_v11, %v237_v37  ;;  %v287_v17 = vmul.f32 %v547_v11, %v239_v38  ;;  %v289_v21 = vmul.f32 %v547_v11, %v241_v41  ;;  %v291_v23 = vmul.f32 %v547_v11, %v243_v47 }
  0x6d   : > { %v286_v16 = vmul.f32 %v549_v12, %v238_v39  ;;  %v288_v18 = vmul.f32 %v549_v12, %v240_v40  ;;  %v290_v22 = vmul.f32 %v549_v12, %v242_v44  ;;  %v292_v24 = vmul.f32 %v549_v12, %v244_v50 }
  0xa9   : > { %v306_v13 = vpop.permute.xlu1 %305  ;;  %v296_v14 = vpop.permute.xlu0 %295 }
  0xaa   : > { %v313_v25 = vmul.f32 %v296_v14, %v285_v15  ;;  %v314_v26 = vmul.f32 %v296_v14, %v286_v16  ;;  %v317_v35 = vmul.f32 %v306_v13, %v289_v21  ;;  %v318_v36 = vmul.f32 %v306_v13, %v290_v22 }
  0xad   : > { %v311_v19 = vpop.permute.xlu1 %310  ;;  %v301_v20 = vpop.permute.xlu0 %300 }
  0xae   : > { %v315_v27 = vmul.f32 %v301_v20, %v287_v17  ;;  %v316_v28 = vmul.f32 %v301_v20, %v288_v18  ;;  %v319_v37 = vmul.f32 %v311_v19, %v291_v23  ;;  %v320_v38 = vmul.f32 %v311_v19, %v292_v24 }
  0xb1   : > { %v329_v29 = vpop.permute.xlu1 %328  ;;  %v324_v30 = vpop.permute.xlu0 %323 }
  0xb2   : > { %v343_v31 = vadd.f32 %v329_v29, %v315_v27  ;;  %v344_v32 = vadd.f32 %v329_v29, %v316_v28  ;;  %v341_v33 = vadd.f32 %v324_v30, %v313_v25  ;;  %v342_v34 = vadd.f32 %v324_v30, %v314_v26 }
  0xb4   : > { %351 = vst [vmem:[%s206_s4 + $0x10] sm:$0xff] %v343_v31  ;;  %352 = vst [vmem:[%s206_s4 + $0x18] sm:$0xff] %v344_v32 }
  0xb5   : > { %349 = vst [vmem:[%s206_s4] sm:$0xff] %v341_v33  ;;  %350 = vst [vmem:[%s206_s4 + $0x8] sm:$0xff] %v342_v34  ;;  %v339_v39 = vpop.permute.xlu1 %338  ;;  %v334_v40 = vpop.permute.xlu0 %333 }
  0xb6   : > { %v347_v41 = vadd.f32 %v339_v39, %v319_v37  ;;  %v348_v42 = vadd.f32 %v339_v39, %v320_v38  ;;  %v345_v43 = vadd.f32 %v334_v40, %v317_v35  ;;  %v346_v44 = vadd.f32 %v334_v40, %v318_v36 }
  0xb8   : > { %355 = vst [vmem:[%s206_s4 + $0x30] sm:$0xff] %v347_v41  ;;  %356 = vst [vmem:[%s206_s4 + $0x38] sm:$0xff] %v348_v42 }
  0xb9   : > { %353 = vst [vmem:[%s206_s4 + $0x20] sm:$0xff] %v345_v43  ;;  %354 = vst [vmem:[%s206_s4 + $0x28] sm:$0xff] %v346_v44 }
  0xba   : > { %591 = shalt.err (!%p588_p6)
}
  0xbb   : > { %s592_s21 = scalar_lea.hbm %s823_s15, 1024  ;;  %s596_s30 = scalar_lea.hbm %s874_s3, 2048 }
  0xbc   : > { %p593_p7 = scmp.ne.s32.totalorder %s823_s15, %s592_s21  ;;  %p597_p13 = scmp.lt.s32.totalorder %s823_s15, %s874_s3 }
  0xbd   : > { %p598_p2 = scmp.lt.s32.totalorder %s596_s30, %s592_s21 }
  0xbe   : > { %p594_p10 = pnand %p593_p7, %p738_p9 }
  0xbf   : > { %p599_p8 = por %p598_p2, %p597_p13 }
  0xc0   : > { %p595_p4 = pneg %p594_p10 }
  0xc2   : > { %p600_p12 = pnand %p599_p8, %p595_p4 }
  0xc4   : > { %603 = shalt.err (!%p600_p12)
}
  0xc5   : > { %s665_s4 = smov 256   ;;  %s666_s8 = smov 16  }
  0xc6   : > { %479 = dma.vmem_to_hbm [thread:$0]  (%p738_p9), %s818_s7, 1024, %s823_s15, %s358_s10, %s665_s4, %s665_s4, %s666_s8  }
  0xc7 PF: > { %s388_s29 = sand.u32 1, %s638_s12   ;;  %p880_p0 = scmp.ge.s32.totalorder %s658_s17, 2 }
  0xc8   : > { %s389_s9 = scalar_lea.sflag [#allocation4], %s388_s29 }
  0xc9   : > { %p486_p1 = pnand %p880_p0, %p745_p11 }
  0xcb   : > { %p487_p3 = pneg %p486_p1 }
  0xcd   : > { %633 = dma.done.wait (%p487_p3), %s389_s9, 1024  }
  0xce   : > { %635 = vsyncadd (%p487_p3), %s389_s9, 4294966272  ;;  %s19_s17 = sadd.s32 1, %s658_s17   ;;  %s881_s12 = smov %s642_s13 }
  0xcf   : > { %p16_p5 = scmp.ge.s32.totalorder %s19_s17, 4   ;;  %s882_s13 = smov %s646_s14 }
  0xd0   : > { %s883_s14 = smov %s743_s26  ;;  %s884_s15 = smov %s654_s16 }
  0xd1   : > { %s885_s16 = smov %s887_s20  ;;  %18 = sbr.rel (!%p16_p5) target bundleno = 6 (0x6), region = 77 }
  0xd6   :  { %394 = vsyncpa [#allocation3], 1 }
  0xd7   :  { %396 = vsyncpa [#allocation3 + $0x1], 1 }
  0xd8   :  { %397 = vsyncpa [#allocation4], 1 }
  0xd9   :  { %399 = vsyncpa [#allocation4 + $0x1], 1 }

</bundles_post_ra>
